<compile_context>
chip_gen: v7x
topology: tpu7x:2x2x1
jax: 0.10.0
libtpu: 0.0.40
codegen_flags: <defaults>
</compile_context>

<pallas_src>
import functools

import jax
import jax.numpy as jnp
from jax.experimental import pallas as pl
from jax.experimental.pallas import tpu as pltpu


def _qnet_kernel(x_ref, w1_ref, b1_ref, w2_ref, b2_ref, w3_ref, b3_ref, out_ref):
    # Feature-major: x (S, tb), wN (out, in), bN (out, 1), out (A, tb).
    # Contractions are over the feature (sublane) axis, so each batch lane is
    # independent -> garbage lanes in a ragged last tile never contaminate
    # valid lanes.
    h1 = jnp.dot(w1_ref[...], x_ref[...], preferred_element_type=jnp.float32)
    h1 = jnp.maximum(h1 + b1_ref[...], 0.0)                       # (H1, tb)
    h2 = jnp.dot(w2_ref[...], h1, preferred_element_type=jnp.float32)
    h2 = jnp.maximum(h2 + b2_ref[...], 0.0)                       # (H2, tb)
    out = jnp.dot(w3_ref[...], h2, preferred_element_type=jnp.float32)
    out_ref[...] = (out + b3_ref[...]).astype(out_ref.dtype)      # (A, tb)


def _choose_batch_tile(batch, requested):
    """Batch lives on the lane axis: tile must be a multiple of 128 or == B."""
    if requested is not None:
        return requested
    if batch <= 256:
        # Single block covering the whole batch (block dim == array dim is
        # always legal, regardless of the 128-lane divisibility rule).
        return batch
    # Target ~2048-row tiles (amortizes per-grid-step overhead), but never
    # exceed ceil(B/2) rounded up to 128 so the grid has >=2 steps and the
    # "parallel" batch axis actually splits across v7x's two TensorCores.
    half = -(-batch // 2)                 # cdiv(B, 2)
    half_rounded = -(-half // 128) * 128  # round up to lane multiple
    return max(128, min(2048, half_rounded))


@functools.partial(jax.jit, static_argnames=("batch_tile",))
def qnetwork_forward(state, params, *, batch_tile=None):
    """Fused 3-layer MLP forward pass in a single Pallas kernel.

    state : (B, state_size) float32
    params: dict with w1 (S,H1), b1 (1,H1), w2 (H1,H2), b2 (1,H2),
            w3 (H2,A), b3 (1,A)   (nn.Linear semantics: y = x @ W + b)
    Returns (B, action_size) float32.
    """
    w1, b1 = params["w1"], params["b1"]
    w2, b2 = params["w2"], params["b2"]
    w3, b3 = params["w3"], params["b3"]

    B, S = state.shape
    H1 = w1.shape[1]
    H2 = w2.shape[1]
    A = w3.shape[1]

    tb = _choose_batch_tile(B, batch_tile)
    assert tb == B or tb % 128 == 0, (
        "batch tile must equal the batch or be a multiple of 128 (lane axis)")

    # Layout plumbing (cheap, tiny for weights): feature-major activations and
    # (out, in) weights so every matmul output is lane-dense in the batch dim.
    x_t = state.T                              # (S, B)
    w1t, w2t, w3t = w1.T, w2.T, w3.T           # (H1,S), (H2,H1), (A,H2)
    b1t = b1.reshape(-1, 1)                    # (H1, 1)
    b2t = b2.reshape(-1, 1)                    # (H2, 1)
    b3t = b3.reshape(-1, 1)                    # (A, 1)

    grid = (pl.cdiv(B, tb),)                   # ragged last block handled by Pallas

    # Weights/biases: full-array blocks, constant index_map -> VMEM-resident.
    rep = lambda arr: pl.BlockSpec(arr.shape, lambda i: (0, 0))

    flops = 2 * B * (S * H1 + H1 * H2 + H2 * A)
    weight_bytes = 4 * (w1.size + b1.size + w2.size + b2.size + w3.size + b3.size)
    bytes_accessed = 4 * B * (S + A) + weight_bytes

    out_t = pl.pallas_call(
        _qnet_kernel,
        out_shape=jax.ShapeDtypeStruct((A, B), jnp.float32),
        grid_spec=pltpu.PrefetchScalarGridSpec(
            num_scalar_prefetch=0,
            grid=grid,
            in_specs=[
                pl.BlockSpec((S, tb), lambda i: (0, i)),   # x stream, default 2-deep pipeline
                rep(w1t), rep(b1t),
                rep(w2t), rep(b2t),
                rep(w3t), rep(b3t),
            ],
            out_specs=pl.BlockSpec((A, tb), lambda i: (0, i)),
        ),
        compiler_params=pltpu.CompilerParams(
            # Batch axis is independent -> megacore-shardable on v7x.
            dimension_semantics=("parallel",)),
        cost_estimate=pl.CostEstimate(
            flops=flops, transcendentals=0, bytes_accessed=bytes_accessed),
    )(x_t, w1t, b1t, w2t, b2t, w3t, b3t)

    return out_t.T                              # (B, A)


def init_qnetwork_params(key, state_size, action_size, hidden_layers=(64, 64)):
    """Deterministic init mimicking nn.Linear's U(-1/sqrt(fan_in), 1/sqrt(fan_in))."""
    sizes = [state_size, *hidden_layers, action_size]
    params = {}
    for idx in range(len(sizes) - 1):
        fan_in, fan_out = sizes[idx], sizes[idx + 1]
        key, kw, kb = jax.random.split(key, 3)
        bound = 1.0 / jnp.sqrt(jnp.float32(fan_in))
        params[f"w{idx + 1}"] = jax.random.uniform(
            kw, (fan_in, fan_out), jnp.float32, -bound, bound)
        params[f"b{idx + 1}"] = jax.random.uniform(
            kb, (1, fan_out), jnp.float32, -bound, bound)
    return params


def _reference_forward(state, params):
    h = jnp.maximum(state @ params["w1"] + params["b1"], 0.0)
    h = jnp.maximum(h @ params["w2"] + params["b2"], 0.0)
    return h @ params["w3"] + params["b3"]


if __name__ == "__main__":
    # Shapes consistent with QNetwork(state_size, action_size, seed) defaults.
    state_size, action_size = 16, 4
    hidden_layers = (64, 64)

    key = jax.random.PRNGKey(0)
    key, kx1, kx2 = jax.random.split(key, 3)
    params = init_qnetwork_params(key, state_size, action_size, hidden_layers)

    # 1) Small batch: single full-batch block, grid of 1.
    batch = 8
    state = jax.random.normal(kx1, (batch, state_size), jnp.float32)
    out = jax.block_until_ready(qnetwork_forward(state, params))
    ref = _reference_forward(state, params)
    assert out.shape == (batch, action_size)
    assert jnp.allclose(out, ref, atol=1e-4, rtol=1e-4), "mismatch (small batch)"

    # 2) Larger, non-multiple batch: exercises the cdiv grid (no pad), a
    #    ragged masked last tile, and the 2-step "parallel" (megacore) path.
    big_batch = 1030
    state_big = jax.random.normal(kx2, (big_batch, state_size), jnp.float32)
    out_big = jax.block_until_ready(qnetwork_forward(state_big, params))
    ref_big = _reference_forward(state_big, params)
    assert out_big.shape == (big_batch, action_size)
    assert jnp.allclose(out_big, ref_big, atol=1e-4, rtol=1e-4), "mismatch (big batch)"

    print("KERNEL_OK")
</pallas_src>

<mosaic_0001>
module attributes {stable_mosaic.version = 11 : i64} {
  func.func @_qnet_kernel(%arg0: i32, %arg1: memref<16x8xf32, #tpu.memory_space<vmem>>, %arg2: memref<64x16xf32, #tpu.memory_space<vmem>>, %arg3: memref<64x1xf32, #tpu.memory_space<vmem>>, %arg4: memref<64x64xf32, #tpu.memory_space<vmem>>, %arg5: memref<64x1xf32, #tpu.memory_space<vmem>>, %arg6: memref<4x64xf32, #tpu.memory_space<vmem>>, %arg7: memref<4x1xf32, #tpu.memory_space<vmem>>, %arg8: memref<4x8xf32, #tpu.memory_space<vmem>>) attributes {dimension_semantics = [#tpu.dimension_semantics<parallel>], iteration_bounds = array<i64: 1>, scalar_prefetch = 0 : i64, scratch_operands = 0 : i64, tpu.core_type = #tpu.core_type<tc>, window_params = [{transform_indices = @transform_0, window_bounds = array<i64: 16, 8>}, {pipeline_mode = #tpu.pipeline_mode<synchronous>, transform_indices = @transform_1, window_bounds = array<i64: 64, 16>}, {pipeline_mode = #tpu.pipeline_mode<synchronous>, transform_indices = @transform_2, window_bounds = array<i64: 64, 1>}, {pipeline_mode = #tpu.pipeline_mode<synchronous>, transform_indices = @transform_3, window_bounds = array<i64: 64, 64>}, {pipeline_mode = #tpu.pipeline_mode<synchronous>, transform_indices = @transform_4, window_bounds = array<i64: 64, 1>}, {pipeline_mode = #tpu.pipeline_mode<synchronous>, transform_indices = @transform_5, window_bounds = array<i64: 4, 64>}, {pipeline_mode = #tpu.pipeline_mode<synchronous>, transform_indices = @transform_6, window_bounds = array<i64: 4, 1>}, {transform_indices = @transform_7, window_bounds = array<i64: 4, 8>}]} {
    %c0 = arith.constant 0 : index
    %c0_0 = arith.constant 0 : index
    %0 = vector.load %arg2[%c0, %c0_0] : memref<64x16xf32, #tpu.memory_space<vmem>>, vector<64x16xf32>
    %c0_1 = arith.constant 0 : index
    %c0_2 = arith.constant 0 : index
    %1 = vector.load %arg1[%c0_1, %c0_2] : memref<16x8xf32, #tpu.memory_space<vmem>>, vector<16x8xf32>
    %cst = arith.constant dense<0.000000e+00> : vector<64x8xf32>
    %2 = tpu.matmul %0, %1, %cst {dimension_numbers = #tpu.dot_dimension_numbers<[1], [0], [0], [1], [0, 0, 1, 1], [], []>} : vector<64x16xf32>, vector<16x8xf32>, vector<64x8xf32> -> vector<64x8xf32>
    %c0_3 = arith.constant 0 : index
    %c0_4 = arith.constant 0 : index
    %3 = vector.load %arg3[%c0_3, %c0_4] : memref<64x1xf32, #tpu.memory_space<vmem>>, vector<64x1xf32>
    %4 = vector.broadcast %3 : vector<64x1xf32> to vector<64x8xf32>
    %5 = arith.addf %2, %4 : vector<64x8xf32>
    %cst_5 = arith.constant 0.000000e+00 : f32
    %6 = vector.broadcast %cst_5 : f32 to vector<64x8xf32>
    %7 = arith.maximumf %5, %6 : vector<64x8xf32>
    %c0_6 = arith.constant 0 : index
    %c0_7 = arith.constant 0 : index
    %8 = vector.load %arg4[%c0_6, %c0_7] : memref<64x64xf32, #tpu.memory_space<vmem>>, vector<64x64xf32>
    %cst_8 = arith.constant dense<0.000000e+00> : vector<64x8xf32>
    %9 = tpu.matmul %8, %7, %cst_8 {dimension_numbers = #tpu.dot_dimension_numbers<[1], [0], [0], [1], [0, 0, 1, 1], [], []>} : vector<64x64xf32>, vector<64x8xf32>, vector<64x8xf32> -> vector<64x8xf32>
    %c0_9 = arith.constant 0 : index
    %c0_10 = arith.constant 0 : index
    %10 = vector.load %arg5[%c0_9, %c0_10] : memref<64x1xf32, #tpu.memory_space<vmem>>, vector<64x1xf32>
    %11 = vector.broadcast %10 : vector<64x1xf32> to vector<64x8xf32>
    %12 = arith.addf %9, %11 : vector<64x8xf32>
    %cst_11 = arith.constant 0.000000e+00 : f32
    %13 = vector.broadcast %cst_11 : f32 to vector<64x8xf32>
    %14 = arith.maximumf %12, %13 : vector<64x8xf32>
    %c0_12 = arith.constant 0 : index
    %c0_13 = arith.constant 0 : index
    %15 = vector.load %arg6[%c0_12, %c0_13] : memref<4x64xf32, #tpu.memory_space<vmem>>, vector<4x64xf32>
    %cst_14 = arith.constant dense<0.000000e+00> : vector<4x8xf32>
    %16 = tpu.matmul %15, %14, %cst_14 {dimension_numbers = #tpu.dot_dimension_numbers<[1], [0], [0], [1], [0, 0, 1, 1], [], []>} : vector<4x64xf32>, vector<64x8xf32>, vector<4x8xf32> -> vector<4x8xf32>
    %c0_15 = arith.constant 0 : index
    %c0_16 = arith.constant 0 : index
    %17 = vector.load %arg7[%c0_15, %c0_16] : memref<4x1xf32, #tpu.memory_space<vmem>>, vector<4x1xf32>
    %18 = vector.broadcast %17 : vector<4x1xf32> to vector<4x8xf32>
    %19 = arith.addf %16, %18 : vector<4x8xf32>
    %c0_17 = arith.constant 0 : index
    %c0_18 = arith.constant 0 : index
    %20 = vector.load %arg8[%c0_17, %c0_18] : memref<4x8xf32, #tpu.memory_space<vmem>>, vector<4x8xf32>
    tpu.vector_store %arg8[%c0_17, %c0_18], %19 {strides = array<i32>} : memref<4x8xf32, #tpu.memory_space<vmem>>, vector<4x8xf32>,
    return
  }
  func.func @transform_0(%arg0: i32) -> (i32, i32) {
    %c0_i32 = arith.constant 0 : i32
    %c0_i32_0 = arith.constant 0 : i32
    return %c0_i32, %arg0 : i32, i32
  }
  func.func @transform_1(%arg0: i32) -> (i32, i32) {
    %c0_i32 = arith.constant 0 : i32
    %c0_i32_0 = arith.constant 0 : i32
    %c0_i32_1 = arith.constant 0 : i32
    return %c0_i32, %c0_i32_0 : i32, i32
  }
  func.func @transform_2(%arg0: i32) -> (i32, i32) {
    %c0_i32 = arith.constant 0 : i32
    %c0_i32_0 = arith.constant 0 : i32
    %c0_i32_1 = arith.constant 0 : i32
    return %c0_i32, %c0_i32_0 : i32, i32
  }
  func.func @transform_3(%arg0: i32) -> (i32, i32) {
    %c0_i32 = arith.constant 0 : i32
    %c0_i32_0 = arith.constant 0 : i32
    %c0_i32_1 = arith.constant 0 : i32
    return %c0_i32, %c0_i32_0 : i32, i32
  }
  func.func @transform_4(%arg0: i32) -> (i32, i32) {
    %c0_i32 = arith.constant 0 : i32
    %c0_i32_0 = arith.constant 0 : i32
    %c0_i32_1 = arith.constant 0 : i32
    return %c0_i32, %c0_i32_0 : i32, i32
  }
  func.func @transform_5(%arg0: i32) -> (i32, i32) {
    %c0_i32 = arith.constant 0 : i32
    %c0_i32_0 = arith.constant 0 : i32
    %c0_i32_1 = arith.constant 0 : i32
    return %c0_i32, %c0_i32_0 : i32, i32
  }
  func.func @transform_6(%arg0: i32) -> (i32, i32) {
    %c0_i32 = arith.constant 0 : i32
    %c0_i32_0 = arith.constant 0 : i32
    %c0_i32_1 = arith.constant 0 : i32
    return %c0_i32, %c0_i32_0 : i32, i32
  }
  func.func @transform_7(%arg0: i32) -> (i32, i32) {
    %c0_i32 = arith.constant 0 : i32
    %c0_i32_0 = arith.constant 0 : i32
    return %c0_i32, %arg0 : i32, i32
  }
}

</mosaic_0001>

<bundles_post_ra>
// kernel: qnetwork_forward.1
= control target key start
LH: loop header
LB: loop body
LE: loop exit
PB: predicated region body
PF: predicated region fallthrough
CT: control target
= control target key end

     0   :  { %vm85_vm0 = vcmask 130048   ;;  %v691_v4 = vmov 0   ;;  %s873_s0 = inlined_call_operand.vmem [shape: f32[16,8], index: 0, kind: input, shape index: {}]   ;;  %s874_s1 = inlined_call_operand.vmem [shape: f32[64,16], index: 1, kind: input, shape index: {}]   ;;  %s875_s2 = inlined_call_operand.vmem [shape: f32[64,1], index: 2, kind: input, shape index: {}]   ;;  %s876_s3 = inlined_call_operand.vmem [shape: f32[64,64], index: 3, kind: input, shape index: {}]   ;;  %s877_s4 = inlined_call_operand.vmem [shape: f32[64,1], index: 4, kind: input, shape index: {}]   ;;  %s878_s5 = inlined_call_operand.vmem [shape: f32[4,64], index: 5, kind: input, shape index: {}]   ;;  %s879_s6 = inlined_call_operand.vmem [shape: f32[4,1], index: 6, kind: input, shape index: {}]   ;;  %s880_s7 = inlined_call_operand.hbm [shape: f32[4,8], index: 7, kind: output, shape index: {}]  }
   0x1   :  { %v35_v0 = vld [vmem:[%s873_s0] sm:$0xff]  ;;  %v36_v1 = vld [vmem:[%s873_s0 + $0x8] sm:$0xff]  ;;  %665 = vset.pattern.permute.xlu0 %v691_v4  ;;  %666 = vset.pattern.permute.xlu1 %v691_v4  ;;  %v39_v7 = vld [vmem:[%s875_s2 + $0x10] sm:$0xff] }
   0x2   :  { %v27_v2 = vld [vmem:[%s874_s1] sm:$0xff]  ;;  %v628_v3 = vpack.c.bf16 %v36_v1, %v35_v0  ;;  %v28_v6 = vld [vmem:[%s874_s1 + $0x8] sm:$0xff]  ;;  %v29_v8 = vld [vmem:[%s874_s1 + $0x10] sm:$0xff]  ;;  %57 = vperm.xlu1 %666, %v39_v7  }
   0x3   :  { %569 = vmatprep.mubr.msk.f32.mxu0 %vm85_vm0, %v27_v2  ;;  %v37_v5 = vld [vmem:[%s875_s2] sm:$0xff]  ;;  %v38_v9 = vld [vmem:[%s875_s2 + $0x8] sm:$0xff]  ;;  %v40_v10 = vld [vmem:[%s875_s2 + $0x18] sm:$0xff] }
   0x4   :  { %629 = vmatprep.subr.bf16.mxu0 %v628_v3  ;;  %47 = vperm.xlu0 %665, %v37_v5   ;;  %v30_v11 = vld [vmem:[%s874_s1 + $0x18] sm:$0xff]  ;;  %v31_v12 = vld [vmem:[%s874_s1 + $0x20] sm:$0xff] }
   0x5   :  { %631 = vmatpush3.bf16.msra.mxu0 %v628_v3  ;;  %v41_v13 = vld [vmem:[%s875_s2 + $0x20] sm:$0xff] }
   0x6   :  { %62 = vperm.xlu1 %666, %v40_v10  }
   0x8   :  { %570 = vmatmul.mubr.msk.f32.vlgmr.msra.gmra.mrb[0].mxu0 %vm85_vm0, %v28_v6  ;;  %52 = vperm.xlu0 %665, %v38_v9  }
   0x9   :  { %572 = vmatprep.mubr.msk.f32.mxu0 %vm85_vm0, %v29_v8 }
   0xa   :  { %12 = vsyncpa [#allocation3], 0  ;;  %v42_v14 = vld [vmem:[%s875_s2 + $0x28] sm:$0xff]  ;;  %v33_v16 = vld [vmem:[%s874_s1 + $0x30] sm:$0xff]  ;;  %vm279_vm1 = vcmask 523264   ;;  %v692_v9 = vmov 0.0|0.0  }
   0xb   :  { %v32_v15 = vld [vmem:[%s874_s1 + $0x28] sm:$0xff]  ;;  %v43_v17 = vld [vmem:[%s875_s2 + $0x30] sm:$0xff]  ;;  %72 = vperm.xlu1 %666, %v42_v14   ;;  %v44_v18 = vld [vmem:[%s875_s2 + $0x38] sm:$0xff]  ;;  %648 = vmatprep.subr.bf16.mxu0 %v692_v9  ;;  %vm693_vm2 = vmmov 0   ;;  %v694_v10 = vmov 0.0   ;;  %vm497_vm3 = vcmask 60416  }
   0xc   :  { %573 = vmatmul.mubr.msk.f32.gmra.mrb[2].mxu0 %vm85_vm0, %v30_v11  ;;  %67 = vperm.xlu0 %665, %v41_v13   ;;  %v34_v19 = vld [vmem:[%s874_s1 + $0x38] sm:$0xff]  ;;  %v231_v20 = vld [vmem:[%s877_s4] sm:$0xff]  ;;  %v232_v21 = vld [vmem:[%s877_s4 + $0x8] sm:$0xff]  ;;  %s695_s1 = smov [#allocation2]  }
   0xd   :  { %575 = vmatprep.mubr.msk.f32.mxu0 %vm85_vm0, %v31_v12  ;;  %v233_v22 = vld [vmem:[%s877_s4 + $0x10] sm:$0xff]  ;;  %v234_v23 = vld [vmem:[%s877_s4 + $0x18] sm:$0xff]  ;;  %v235_v24 = vld [vmem:[%s877_s4 + $0x20] sm:$0xff]  ;;  %s505_s18 = sshll.u32 %s695_s1, 4  ;;  %s506_s18 = int_to_ptr.vmem [resolvable:$true] %s505_s18 }
   0xe   :  { %v236_v25 = vld [vmem:[%s877_s4 + $0x28] sm:$0xff]  ;;  %v237_v26 = vld [vmem:[%s877_s4 + $0x30] sm:$0xff]  ;;  %v238_v27 = vld [vmem:[%s877_s4 + $0x38] sm:$0xff]  ;;  %s667_s19 = scalar_lea.vmem %s506_s18, 64  ;;  %p672_p1 = scmp.lt.s32.totalorder %s506_s18, %s506_s18 }
   0xf   :  { %82 = vperm.xlu1 %666, %v44_v18   ;;  %v418_v28 = vld [vmem:[%s879_s6] sm:$0xf]  ;;  %v224_v2 = vld [vmem:[%s876_s3 + $0x8] sm:$0xff]  ;;  %v225_v3 = vld [vmem:[%s876_s3 + $0x10] sm:$0xff]  ;;  %p668_p0 = scmp.ne.s32.totalorder %s506_s18, %s667_s19  ;;  %p673_p2 = scmp.lt.s32.totalorder %s667_s19, %s667_s19 }
  0x10   :  { %576 = vmatmul.mubr.msk.f32.gmra.mrb[4].mxu0 %vm85_vm0, %v32_v15  ;;  %77 = vperm.xlu0 %665, %v43_v17   ;;  %v223_v29 = vld [vmem:[%s876_s3] sm:$0xff]  ;;  %v226_v4 = vld [vmem:[%s876_s3 + $0x18] sm:$0xff]  ;;  %v228_v6 = vld [vmem:[%s876_s3 + $0x28] sm:$0xff] }
  0x11   :  { %578 = vmatprep.mubr.msk.f32.mxu0 %vm85_vm0, %v33_v16  ;;  %597 = vmatprep.mubr.msk.f32.mxu1 %vm279_vm1, %v223_v29  ;;  %v227_v5 = vld [vmem:[%s876_s3 + $0x20] sm:$0xff]  ;;  %v229_v7 = vld [vmem:[%s876_s3 + $0x30] sm:$0xff]  ;;  %v230_v8 = vld [vmem:[%s876_s3 + $0x38] sm:$0xff]  ;;  %p674_p3 = por %p673_p2, %p672_p1 }
  0x13   :  { %246 = vperm.xlu1 %666, %v232_v21   ;;  %p675_p4 = pnand %p674_p3, %p668_p0 }
  0x14   :  { %579 = vmatmul.mubr.msk.f32.gmra.mrb[6].mxu0 %vm85_vm0, %v34_v19  ;;  %241 = vperm.xlu0 %665, %v231_v20  }
  0x15   :  { %625 = vmatprep.mubr.msk.f32.mxu0 %vm693_vm2, %v694_v10 }
  0x17   :  { %256 = vperm.xlu1 %666, %v234_v23  }
  0x18   :  { %251 = vperm.xlu0 %665, %v233_v22  }
  0x1b   :  { %266 = vperm.xlu1 %666, %v236_v25  }
  0x1c   :  { %261 = vperm.xlu0 %665, %v235_v24  }
  0x1f   :  { %276 = vperm.xlu1 %666, %v238_v27  }
  0x20   :  { %271 = vperm.xlu0 %665, %v237_v26  }
  0x24   :  { %421 = vperm.xlu0 %665, %v418_v28  }
  0x81   :  { %v58_v31 = vpop.permute.xlu1 %57 }
  0x83   :  { %v48_v30 = vpop.permute.xlu0 %47 }
  0x85   :  { %v63_v33 = vpop.permute.xlu1 %62 }
  0x87   :  { %v53_v32 = vpop.permute.xlu0 %52 }
  0x8a   :  { %v73_v43 = vpop.permute.xlu1 %72 }
  0x8b   :  { %v68_v46 = vpop.permute.xlu0 %67 }
  0x8e   :  { %v83_v55 = vpop.permute.xlu1 %82 }
  0x8f   :  { %v78_v58 = vpop.permute.xlu0 %77 }
  0x92   :  { %v247_v11 = vpop.permute.xlu1 %246 }
  0x93   :  { %v242_v12 = vpop.permute.xlu0 %241 }
  0x96   :  { %v257_v13 = vpop.permute.xlu1 %256 }
  0x97   :  { %v252_v15 = vpop.permute.xlu0 %251 }
  0x9a   :  { %v267_v24 = vpop.permute.xlu1 %266 }
  0x9b   :  { %v262_v27 = vpop.permute.xlu0 %261 }
  0xdb   :  { %v571_v34 = vpop.f32.mrb[0].mxu0 }
  0xdc   :  { %v182_v35 = vadd.f32 %v571_v34, %v53_v32  ;;  %v176_v36 = vpop.f32.mrb[1].mxu0 }
  0xdd   :  { %v177_v37 = vadd.f32 %v176_v36, %v48_v30  ;;  %v277_v36 = vpop.permute.xlu1 %276 }
  0xde   :  { %v216_v38 = vmax.f32 %v182_v35, 0.0 }
  0xdf   :  { %v215_v39 = vmax.f32 %v177_v37, 0.0  ;;  %v574_v40 = vpop.f32.mrb[2].mxu0 }
  0xe0   :  { %v192_v41 = vadd.f32 %v574_v40, %v63_v33  ;;  %v186_v42 = vpop.f32.mrb[3].mxu0 }
  0xe1   :  { %v187_v44 = vadd.f32 %v186_v42, %v58_v31  ;;  %v632_v45 = vpack.c.bf16 %v216_v38, %v215_v39  ;;  %v272_v39 = vpop.permute.xlu0 %271 }
  0xe2   :  { %v218_v47 = vmax.f32 %v192_v41, 0.0 }
  0xe3   :  { %v217_v48 = vmax.f32 %v187_v44, 0.0  ;;  %v577_v49 = vpop.f32.mrb[4].mxu0  ;;  %633 = vmatprep.subr.bf16.mxu1 %v632_v45 }
  0xe4   :  { %v202_v50 = vadd.f32 %v577_v49, %v73_v43  ;;  %v196_v51 = vpop.f32.mrb[5].mxu0  ;;  %635 = vmatpush3.bf16.msra.mxu1 %v632_v45 }
  0xe5   :  { %v636_v52 = vpack.c.bf16 %v218_v47, %v217_v48  ;;  %v197_v53 = vadd.f32 %v196_v51, %v68_v46  ;;  %v417_v47 = vld [vmem:[%s878_s5] sm:$0xf]  ;;  %v422_v48 = vpop.permute.xlu0 %421 }
  0xe6   :  { %v220_v54 = vmax.f32 %v202_v50, 0.0 }
  0xe7   :  { %v219_v56 = vmax.f32 %v197_v53, 0.0  ;;  %v580_v57 = vpop.f32.mrb[6].mxu0  ;;  %637 = vmatprep.subr.bf16.mxu1 %v636_v52 }
  0xe8   :  { %v212_v59 = vadd.f32 %v580_v57, %v83_v55  ;;  %v206_v60 = vpop.f32.mrb[7].mxu0  ;;  %639 = vmatpush3.bf16.msra.mxu1 %v636_v52 }
  0xe9   :  { %v640_v61 = vpack.c.bf16 %v220_v54, %v219_v56  ;;  %v207_v62 = vadd.f32 %v206_v60, %v78_v58 }
  0xea   :  { %v222_v63 = vmax.f32 %v212_v59, 0.0 }
  0xeb   :  { %v221_v0 = vmax.f32 %v207_v62, 0.0  ;;  %641 = vmatprep.subr.bf16.mxu1 %v640_v61 }
  0xec   :  { %643 = vmatpush3.bf16.msra.mxu1 %v640_v61 }
  0xed   :  { %v644_v1 = vpack.c.bf16 %v222_v63, %v221_v0 }
  0xef   :  { %645 = vmatprep.subr.bf16.mxu1 %v644_v1 }
  0xf0   :  { %647 = vmatpush3.bf16.msra.mxu1 %v644_v1 }
  0xf3   :  { %598 = vmatmul.mubr.msk.f32.vlgmr.msra.gmra.mrb[0].mxu1 %vm279_vm1, %v224_v2 }
  0xf4   :  { %600 = vmatprep.mubr.msk.f32.mxu1 %vm279_vm1, %v225_v3 }
  0xf7   :  { %601 = vmatmul.mubr.msk.f32.gmra.mrb[2].mxu1 %vm279_vm1, %v226_v4 }
  0xf8   :  { %603 = vmatprep.mubr.msk.f32.mxu1 %vm279_vm1, %v227_v5 }
  0xfb   :  { %604 = vmatmul.mubr.msk.f32.gmra.mrb[4].mxu1 %vm279_vm1, %v228_v6 }
  0xfc   :  { %606 = vmatprep.mubr.msk.f32.mxu1 %vm279_vm1, %v229_v7 }
  0xff   :  { %607 = vmatmul.mubr.msk.f32.gmra.mrb[6].mxu1 %vm279_vm1, %v230_v8 }
 0x1c6   :  { %v599_v14 = vpop.f32.mrb[0].mxu1 }
 0x1c7   :  { %v376_v16 = vadd.f32 %v599_v14, %v247_v11  ;;  %v370_v17 = vpop.f32.mrb[1].mxu1 }
 0x1c8   :  { %v371_v18 = vadd.f32 %v370_v17, %v242_v12 }
 0x1c9   :  { %v410_v19 = vmax.f32 %v376_v16, 0.0 }
 0x1ca   :  { %v409_v20 = vmax.f32 %v371_v18, 0.0  ;;  %v602_v21 = vpop.f32.mrb[2].mxu1 }
 0x1cb   :  { %v386_v22 = vadd.f32 %v602_v21, %v257_v13  ;;  %v380_v23 = vpop.f32.mrb[3].mxu1 }
 0x1cc   :  { %v649_v25 = vpack.c.bf16 %v410_v19, %v409_v20  ;;  %v381_v26 = vadd.f32 %v380_v23, %v252_v15 }
 0x1cd   :  { %v412_v28 = vmax.f32 %v386_v22, 0.0 }
 0x1ce   :  { %v411_v29 = vmax.f32 %v381_v26, 0.0  ;;  %v605_v30 = vpop.f32.mrb[4].mxu1  ;;  %650 = vmatpush3.bf16.msra.mxu0 %v649_v25 }
 0x1cf   :  { %v396_v31 = vadd.f32 %v605_v30, %v267_v24  ;;  %v390_v32 = vpop.f32.mrb[5].mxu1  ;;  %651 = vmatprep.subr.bf16.mxu0 %v692_v9 }
 0x1d0   :  { %v652_v33 = vpack.c.bf16 %v412_v28, %v411_v29  ;;  %v391_v34 = vadd.f32 %v390_v32, %v262_v27 }
 0x1d1   :  { %v414_v35 = vmax.f32 %v396_v31, 0.0 }
 0x1d2   :  { %v413_v37 = vmax.f32 %v391_v34, 0.0  ;;  %v608_v38 = vpop.f32.mrb[6].mxu1  ;;  %653 = vmatpush3.bf16.msra.mxu0 %v652_v33 }
 0x1d3   :  { %v406_v40 = vadd.f32 %v608_v38, %v277_v36  ;;  %v400_v41 = vpop.f32.mrb[7].mxu1  ;;  %654 = vmatprep.subr.bf16.mxu0 %v692_v9 }
 0x1d4   :  { %v655_v42 = vpack.c.bf16 %v414_v35, %v413_v37  ;;  %v401_v43 = vadd.f32 %v400_v41, %v272_v39 }
 0x1d5   :  { %v416_v44 = vmax.f32 %v406_v40, 0.0 }
 0x1d6   :  { %v415_v45 = vmax.f32 %v401_v43, 0.0  ;;  %656 = vmatpush3.bf16.msra.mxu0 %v655_v42 }
 0x1d7   :  { %657 = vmatprep.subr.bf16.mxu0 %v692_v9 }
 0x1d8   :  { %v658_v46 = vpack.c.bf16 %v416_v44, %v415_v45 }
 0x1da   :  { %659 = vmatpush3.bf16.msra.mxu0 %v658_v46 }
 0x1dd   :  { %626 = vmatmul.mubr.msk.f32.vlgmr.msra.gmra.mrb[8].mxu0 %vm279_vm1, %v417_v47 }
 0x2b0   :  { %v493_v49 = vpop.f32.mrb[8].mxu0 }
 0x2b1   :  { %v494_v50 = vadd.f32 %v493_v49, %v422_v48  ;;  %v627_v51 = vpop.f32.mrb[9].mxu0 }
 0x2b3   :  { %498 = vst.msk [vmem:[#allocation2] sm:$0xf] %vm497_vm3, %v494_v50 }
 0x2b4   :  { %678 = shalt.err (!%p675_p4)
}
 0x2b5   :  { %s679_s21 = scalar_lea.hbm %s880_s7, 64 }
 0x2b6   :  { %p680_p5 = scmp.ne.s32.totalorder %s880_s7, %s679_s21  ;;  %p683_p6 = scmp.lt.u32.totalorder %s679_s21, %s880_s7 }
 0x2b8   :  { %p685_p7 = pnand %p683_p6, %p680_p5 }
 0x2ba   :  { %688 = shalt.err (!%p685_p7)
}
 0x2bb   :  { %508 = dma.vmem_to_hbm [thread:$0]  %s506_s18, 64, %s880_s7, [#allocation3]  }
 0x2bc   :  { %689 = dma.done.wait [#allocation3], 64  }
 0x2bd   :  { %690 = vsyncadd [#allocation3], 4294967232 }
 0x2be   :  { %512 = vsyncpa [#allocation3], 1 }

</bundles_post_ra>
